<compile_context>
chip_gen: v7x
topology: tpu7x:2x2x1
jax: 0.10.0
libtpu: 0.0.40
codegen_flags: <defaults>
</compile_context>

<pallas_src>
import jax
import jax.numpy as jnp
from jax.experimental import pallas as pl
from jax.experimental.pallas import tpu as pltpu


def _round_up(n, m):
    return ((n + m - 1) // m) * m


# ----------------------------- Pallas kernel ------------------------------ #

def _make_kernel(num_states, chunk):
    """Build the embedding-lookup kernel for a fixed (static) S and row chunk."""

    def kernel(x_ref, w_ref, out_ref):
        # x_ref:   (TB, F) uint8/int32  x[b, v] replicated over the R*C columns
        # w_ref:   (S,  F) float32      w[s, (v*R+r)*C + c] = log_weight[v,r,c,s]
        # out_ref: (TB, F) float32      out[b, j] = w[x[b, j], j]
        feat = w_ref.shape[1]
        # Keep the weight rows resident in vregs only when they are tiny
        # (<= 8 vregs); otherwise re-load each row from VMEM (cheap vld).
        hoist = num_states * feat <= 8 * 1024
        w_all = w_ref[...] if hoist else None

        def w_row(s):
            return w_all[s:s + 1, :] if hoist else w_ref[s:s + 1, :]

        n_chunks = out_ref.shape[0] // chunk

        # Row-chunked body: bounds vreg live ranges (no spills at large tiles)
        # and keeps the output store stream contiguous and lane-dense.
        @pl.loop(0, n_chunks)
        def _(c):
            r0 = pl.multiple_of(c * chunk, chunk)
            x = x_ref[pl.ds(r0, chunk), :].astype(jnp.int32)       # (chunk, F)
            # Exactly one select fires per element (states outside [0, S)
            # yield 0, matching one_hot semantics).
            acc = jnp.where(x == 0, w_row(0), 0.0)
            for s in range(1, num_states):                          # unrolled
                acc = acc + jnp.where(x == s, w_row(s), 0.0)
            out_ref[pl.ds(r0, chunk), :] = acc.astype(out_ref.dtype)

    return kernel


def _choose_tile_b(batch, feat_pad, num_states, x_itemsize, out_itemsize):
    """VMEM-aware, occupancy-aware batch-tile selection."""
    budget = 20 * 1024 * 1024                       # fits v7x 64 MiB w/ headroom
    w_bytes = 2 * num_states * feat_pad * 4         # weight block (+dbl buffer)
    per_row = 2 * feat_pad * (x_itemsize + out_itemsize)   # dbl-buffered x+out
    vmem_cap = max(64, (budget - w_bytes) // per_row)
    # Aim for >= ~2 MiB of output per grid step so the ~0.35us/step overhead
    # is amortized; cap at 2048 rows.
    target = max(256, (2 * 1024 * 1024) // (out_itemsize * feat_pad))
    tile_b = min(int(vmem_cap), int(target), 2048)
    # Give the pipeline / both v7x TensorCores >= ~8 steps when batch allows.
    if batch >= 8 * 256:
        tile_b = min(tile_b, _round_up(pl.cdiv(batch, 8), 64))
    tile_b = min(tile_b, _round_up(batch, 64))
    tile_b = max(64, (tile_b // 64) * 64)
    return tile_b


def monotonic_embeddings_pallas(x_rep, w_states, *, tile_b, chunk=64,
                                out_dtype=jnp.float32):
    """x_rep: (B, F) uint8/int32, w_states: (S, F) f32 -> (B, F) gathered logs.

    F must be a multiple of 128, B a multiple of tile_b, tile_b a multiple of
    chunk (the class wrapper guarantees all of this).
    """
    B, F = x_rep.shape
    S = w_states.shape[0]
    chunk = min(chunk, tile_b)
    assert F % 128 == 0 and B % tile_b == 0 and tile_b % chunk == 0

    out_itemsize = jnp.dtype(out_dtype).itemsize
    cost = pl.CostEstimate(
        flops=int(3 * S * B * F),
        transcendentals=0,
        bytes_accessed=int(B * F * (x_rep.dtype.itemsize + out_itemsize)
                           + S * F * 4),
    )

    return pl.pallas_call(
        _make_kernel(S, chunk),
        out_shape=jax.ShapeDtypeStruct((B, F), out_dtype),
        grid=(B // tile_b,),
        in_specs=[
            pl.BlockSpec((tile_b, F), lambda i: (i, 0)),   # x tile
            pl.BlockSpec((S, F), lambda i: (0, 0)),        # resident weight table
        ],
        out_specs=pl.BlockSpec((tile_b, F), lambda i: (i, 0)),
        compiler_params=pltpu.CompilerParams(
            dimension_semantics=("parallel",),
            vmem_limit_bytes=48 * 1024 * 1024),
        cost_estimate=cost,
    )(x_rep, w_states)


# ---------------------- Module (parameters + wrapper) ---------------------- #

class MonotonicEmbeddingsPallas:
    """JAX/Pallas port of MonotonicEmbeddings (forward pass only).

    The torch module derives num_variables / num_replicas from the region
    graph (rg_nodes); that bookkeeping has no array equivalent, so they are
    passed in directly.
    """

    def __init__(self, num_variables, num_replicas=1, num_components=2,
                 num_states=2, init_scale=1.0, seed=0):
        self.num_variables = num_variables
        self.num_replicas = num_replicas
        self.num_components = num_components
        self.num_states = num_states

        # init_params_(weight, 'dirichlet', init_scale) then log():
        key = jax.random.PRNGKey(seed)
        probs = jax.random.dirichlet(
            key, alpha=jnp.full((num_states,), init_scale, jnp.float32),
            shape=(num_variables, num_replicas, num_components))
        self.weight = jnp.log(probs)                          # (V, R, C, S)

        # Parameter-only packing, done once outside the hot path:
        V, R, C, S = self.weight.shape
        self._feat = V * R * C
        self._feat_pad = _round_up(self._feat, 128)
        w_states = jnp.transpose(self.weight, (3, 0, 1, 2)).reshape(S, self._feat)
        self._w_states = jnp.pad(
            w_states, ((0, 0), (0, self._feat_pad - self._feat)))
        # uint8 states for the OHE regime (S <= 256) -> 4x less x traffic.
        self._x_dtype = jnp.uint8 if num_states <= 256 else jnp.int32

    def log_pf(self):
        # logsumexp over states, unsqueeze(0): (1, V, R, C)
        return jax.scipy.special.logsumexp(self.weight, axis=-1)[None]

    def __call__(self, x):
        """x: (B, V) integer states -> log_y: (B, V, R, C)."""
        B, V = x.shape
        assert V == self.num_variables
        R, C = self.num_replicas, self.num_components

        tile_b = _choose_tile_b(B, self._feat_pad, self.num_states,
                                jnp.dtype(self._x_dtype).itemsize, 4)

        # Replicate x over the R*C output columns (v-major, so the final
        # reshape below is free), carried as uint8, then pad to lane/tile
        # multiples (zero pads select zero weight columns -> sliced off).
        x_rep = jnp.repeat(x.astype(self._x_dtype), R * C, axis=1)   # (B, F)
        x_rep = jnp.pad(x_rep, ((0, 0), (0, self._feat_pad - self._feat)))
        b_pad = _round_up(B, tile_b)
        x_rep = jnp.pad(x_rep, ((0, b_pad - B), (0, 0)))

        out = monotonic_embeddings_pallas(
            x_rep, self._w_states, tile_b=tile_b)         # (B_pad, F_pad)
        return out[:B, :self._feat].reshape(B, V, R, C)


# --------------------------------- main ------------------------------------ #

def _reference_forward(x, weight):
    """Plain-JAX replica of the torch OHE path."""
    S = weight.shape[-1]
    ohe = jax.nn.one_hot(x, S, dtype=weight.dtype)                # (B, V, S)
    return jnp.einsum('bvs,vrcs->bvrc', ohe, weight)              # (B, V, R, C)


if __name__ == "__main__":
    # Config 1: lane-dense (V*R*C = 128), S=4.
    B, V, R, C, S = 512, 32, 1, 4, 4
    module = MonotonicEmbeddingsPallas(
        num_variables=V, num_replicas=R, num_components=C,
        num_states=S, init_scale=1.0, seed=0)
    x = jax.random.randint(jax.random.PRNGKey(0), (B, V), 0, S, dtype=jnp.int32)
    out = jax.block_until_ready(module(x))
    assert out.shape == (B, V, R, C), out.shape
    ref = _reference_forward(x, module.weight)
    assert jnp.allclose(out, ref, rtol=1e-5, atol=1e-5), (
        float(jnp.max(jnp.abs(out - ref))))

    # Config 2: ragged shapes exercising lane / batch padding paths.
    B2, V2, R2, C2, S2 = 37, 5, 2, 3, 3
    module2 = MonotonicEmbeddingsPallas(
        num_variables=V2, num_replicas=R2, num_components=C2,
        num_states=S2, init_scale=1.0, seed=1)
    x2 = jax.random.randint(jax.random.PRNGKey(1), (B2, V2), 0, S2,
                            dtype=jnp.int32)
    out2 = jax.block_until_ready(module2(x2))
    ref2 = _reference_forward(x2, module2.weight)
    assert jnp.allclose(out2, ref2, rtol=1e-5, atol=1e-5), (
        float(jnp.max(jnp.abs(out2 - ref2))))

    # log_pf sanity (parameter-only normalizer, not part of the hot path).
    lz = module.log_pf()
    assert lz.shape == (1, V, R, C), lz.shape

    print("KERNEL_OK")
</pallas_src>

<mosaic_0001>
module attributes {stable_mosaic.version = 11 : i64} {
  func.func @kernel(%arg0: i32, %arg1: memref<512x128xi8, #tpu.memory_space<vmem>>, %arg2: memref<4x128xf32, #tpu.memory_space<vmem>>, %arg3: memref<512x128xf32, #tpu.memory_space<vmem>>) attributes {dimension_semantics = [#tpu.dimension_semantics<parallel>], iteration_bounds = array<i64: 1>, scalar_prefetch = 0 : i64, scratch_operands = 0 : i64, tpu.core_type = #tpu.core_type<tc>, window_params = [{transform_indices = @transform_0, window_bounds = array<i64: 512, 128>}, {pipeline_mode = #tpu.pipeline_mode<synchronous>, transform_indices = @transform_1, window_bounds = array<i64: 4, 128>}, {transform_indices = @transform_2, window_bounds = array<i64: 512, 128>}]} {
    %c0 = arith.constant 0 : index
    %c0_0 = arith.constant 0 : index
    %0 = vector.load %arg2[%c0, %c0_0] : memref<4x128xf32, #tpu.memory_space<vmem>>, vector<4x128xf32>
    %c0_i32 = arith.constant 0 : i32
    %c8_i32 = arith.constant 8 : i32
    %1 = arith.addi %c0_i32, %c8_i32 : i32
    %c1_i32 = arith.constant 1 : i32
    scf.for %arg4 = %c0_i32 to %1 step %c1_i32  : i32 {
      %c1_i32_2 = arith.constant 1 : i32
      %2 = arith.muli %arg4, %c1_i32_2 : i32
      %c0_i32_3 = arith.constant 0 : i32
      %3 = arith.addi %c0_i32_3, %2 : i32
      %c64_i32 = arith.constant 64 : i32
      %4 = arith.muli %3, %c64_i32 : i32
      %5 = tpu.assume_multiple %4, 64 : i32
      %6 = arith.index_cast %5 : i32 to index
      %c0_4 = arith.constant 0 : index
      %7 = vector.load %arg1[%6, %c0_4] : memref<512x128xi8, #tpu.memory_space<vmem>>, vector<64x128xi8>
      %8 = arith.extui %7 : vector<64x128xi8> to vector<64x128xi32>
      %c0_i32_5 = arith.constant 0 : i32
      %9 = vector.broadcast %c0_i32_5 : i32 to vector<64x128xi32>
      %10 = arith.cmpi eq, %8, %9 : vector<64x128xi32>
      %11 = vector.extract_strided_slice %0 {offsets = [0, 0], sizes = [1, 128], strides = [1, 1]} : vector<4x128xf32> to vector<1x128xf32>
      %cst = arith.constant 0.000000e+00 : f32
      %12 = vector.shape_cast %11 : vector<1x128xf32> to vector<1x128xf32>
      %13 = vector.broadcast %12 : vector<1x128xf32> to vector<64x128xf32>
      %14 = vector.broadcast %cst : f32 to vector<64x128xf32>
      %15 = arith.select %10, %13, %14 : vector<64x128xi1>, vector<64x128xf32>
      %c1_i32_6 = arith.constant 1 : i32
      %16 = vector.broadcast %c1_i32_6 : i32 to vector<64x128xi32>
      %17 = arith.cmpi eq, %8, %16 : vector<64x128xi32>
      %18 = vector.extract_strided_slice %0 {offsets = [1, 0], sizes = [1, 128], strides = [1, 1]} : vector<4x128xf32> to vector<1x128xf32>
      %cst_7 = arith.constant 0.000000e+00 : f32
      %19 = vector.shape_cast %18 : vector<1x128xf32> to vector<1x128xf32>
      %20 = vector.broadcast %19 : vector<1x128xf32> to vector<64x128xf32>
      %21 = vector.broadcast %cst_7 : f32 to vector<64x128xf32>
      %22 = arith.select %17, %20, %21 : vector<64x128xi1>, vector<64x128xf32>
      %23 = arith.addf %15, %22 : vector<64x128xf32>
      %c2_i32 = arith.constant 2 : i32
      %24 = vector.broadcast %c2_i32 : i32 to vector<64x128xi32>
      %25 = arith.cmpi eq, %8, %24 : vector<64x128xi32>
      %26 = vector.extract_strided_slice %0 {offsets = [2, 0], sizes = [1, 128], strides = [1, 1]} : vector<4x128xf32> to vector<1x128xf32>
      %cst_8 = arith.constant 0.000000e+00 : f32
      %27 = vector.shape_cast %26 : vector<1x128xf32> to vector<1x128xf32>
      %28 = vector.broadcast %27 : vector<1x128xf32> to vector<64x128xf32>
      %29 = vector.broadcast %cst_8 : f32 to vector<64x128xf32>
      %30 = arith.select %25, %28, %29 : vector<64x128xi1>, vector<64x128xf32>
      %31 = arith.addf %23, %30 : vector<64x128xf32>
      %c3_i32 = arith.constant 3 : i32
      %32 = vector.broadcast %c3_i32 : i32 to vector<64x128xi32>
      %33 = arith.cmpi eq, %8, %32 : vector<64x128xi32>
      %34 = vector.extract_strided_slice %0 {offsets = [3, 0], sizes = [1, 128], strides = [1, 1]} : vector<4x128xf32> to vector<1x128xf32>
      %cst_9 = arith.constant 0.000000e+00 : f32
      %35 = vector.shape_cast %34 : vector<1x128xf32> to vector<1x128xf32>
      %36 = vector.broadcast %35 : vector<1x128xf32> to vector<64x128xf32>
      %37 = vector.broadcast %cst_9 : f32 to vector<64x128xf32>
      %38 = arith.select %33, %36, %37 : vector<64x128xi1>, vector<64x128xf32>
      %39 = arith.addf %31, %38 : vector<64x128xf32>
      %40 = arith.index_cast %5 : i32 to index
      %c0_10 = arith.constant 0 : index
      %41 = vector.load %arg3[%40, %c0_10] : memref<512x128xf32, #tpu.memory_space<vmem>>, vector<64x128xf32>
      tpu.vector_store %arg3[%40, %c0_10], %39 {strides = array<i32>} : memref<512x128xf32, #tpu.memory_space<vmem>>, vector<64x128xf32>,
    }
    %c8_i32_1 = arith.constant 8 : i32
    return
  }
  func.func @transform_0(%arg0: i32) -> (i32, i32) {
    %c0_i32 = arith.constant 0 : i32
    %c0_i32_0 = arith.constant 0 : i32
    return %arg0, %c0_i32 : i32, i32
  }
  func.func @transform_1(%arg0: i32) -> (i32, i32) {
    %c0_i32 = arith.constant 0 : i32
    %c0_i32_0 = arith.constant 0 : i32
    %c0_i32_1 = arith.constant 0 : i32
    return %c0_i32, %c0_i32_0 : i32, i32
  }
  func.func @transform_2(%arg0: i32) -> (i32, i32) {
    %c0_i32 = arith.constant 0 : i32
    %c0_i32_0 = arith.constant 0 : i32
    return %arg0, %c0_i32 : i32, i32
  }
}

</mosaic_0001>

<bundles_post_ra>
// kernel: tpu_custom_call.1
= control target key start
LH: loop header
LB: loop body
LE: loop exit
PB: predicated region body
PF: predicated region fallthrough
CT: control target
= control target key end

     0   :  { %7 = vsyncpa [#allocation3], 0  ;;  %s452_s0 = inlined_call_operand.hbm [shape: u8[512,128], index: 0, kind: input, shape index: {}]   ;;  %s453_s1 = inlined_call_operand.hbm [shape: f32[4,128], index: 1, kind: input, shape index: {}]   ;;  %s454_s2 = inlined_call_operand.hbm [shape: f32[512,128], index: 2, kind: output, shape index: {}]  }
   0x1   :  { %8 = vsyncpa [#allocation6], 0 }
   0x2   :  { %9 = vsyncpa [#allocation4], 0  ;;  %s303_s9 = smov [#allocation2]   ;;  %s223_s13 = scalar_lea.hbm %s452_s0, 2048 }
   0x3   :  { %s15_s10 = sshll.u32 %s303_s9, 4  ;;  %p224_p0 = scmp.ne.s32.totalorder %s452_s0, %s223_s13  ;;  %s16_s10 = int_to_ptr.vmem [resolvable:$true] %s15_s10 }
   0x4   :  { %p227_p1 = scmp.lt.u32.totalorder %s223_s13, %s452_s0 }
   0x6   :  { %p229_p2 = pnand %p227_p1, %p224_p0 }
   0x8   :  { %232 = shalt.err (!%p229_p2)
}
   0x9   :  { %s233_s18 = scalar_lea.vmem %s16_s10, 2048  ;;  %p238_p4 = scmp.lt.s32.totalorder %s16_s10, %s16_s10 }
   0xa   :  { %p234_p3 = scmp.ne.s32.totalorder %s16_s10, %s233_s18  ;;  %p239_p5 = scmp.lt.s32.totalorder %s233_s18, %s233_s18 }
   0xc   :  { %p240_p6 = por %p239_p5, %p238_p4 }
   0xe   :  { %p241_p7 = pnand %p240_p6, %p234_p3 }
  0x10   :  { %244 = shalt.err (!%p241_p7)
}
  0x11   :  { %s304_s19 = smov 128   ;;  %s305_s20 = smov 8  }
  0x12   :  { %21 = dma.hbm_to_vmem [thread:$0]  %s452_s0, 2048, %s16_s10, [#allocation3], %s304_s19, %s304_s19, %s305_s20  }
  0x13   :  { %s306_s23 = smov [#allocation5]   ;;  %s245_s27 = scalar_lea.hbm %s453_s1, 64 }
  0x14   :  { %s28_s24 = sshll.u32 %s306_s23, 4  ;;  %p246_p8 = scmp.ne.s32.totalorder %s453_s1, %s245_s27  ;;  %s29_s24 = int_to_ptr.vmem [resolvable:$true] %s28_s24 }
  0x15   :  { %p249_p9 = scmp.lt.u32.totalorder %s245_s27, %s453_s1 }
  0x17   :  { %p251_p10 = pnand %p249_p9, %p246_p8 }
  0x19   :  { %254 = shalt.err (!%p251_p10)
}
  0x1a   :  { %s255_s4 = scalar_lea.vmem %s29_s24, 64  ;;  %p260_p12 = scmp.lt.s32.totalorder %s29_s24, %s29_s24 }
  0x1b   :  { %p256_p11 = scmp.ne.s32.totalorder %s29_s24, %s255_s4  ;;  %p261_p13 = scmp.lt.s32.totalorder %s255_s4, %s255_s4 }
  0x1d   :  { %p262_p0 = por %p261_p13, %p260_p12 }
  0x1f   :  { %p263_p1 = pnand %p262_p0, %p256_p11 }
  0x21   :  { %266 = shalt.err (!%p263_p1)
}
  0x22   :  { %31 = dma.hbm_to_vmem [thread:$0]  %s453_s1, 64, %s29_s24, [#allocation6]  }
  0x23   :  { %293 = dma.done.wait [#allocation3], 2048  }
  0x24   :  { %294 = vsyncadd [#allocation3], 4294965248 }
  0x25   :  { %295 = dma.done.wait [#allocation6], 64  }
  0x26   :  { %296 = vsyncadd [#allocation6], 4294967232  ;;  %v350_v0 = vld [vmem:[#allocation5] sm:$0xf]  ;;  %s352_s6 = smov 0  }
  0x27 LB: > { %v76_v1 = vlaneseq  ;;  %s208_s7 = sshll.u32 %s301_s6, 6  ;;  %s44_s6 = sadd.s32 1, %s301_s6   ;;  %s301_s6 = sphi %s352_s6, %s44_s6  }
  0x28   : > { %s46_s1 = sshra.s32 %s208_s7, 5  ;;  %s392_s10 = scalar_lea.vmem [#allocation7], %s208_s7 }
  0x29   : > { %v77_v2 = vshrl.u32 %v76_v1, 7  ;;  %s209_s8 = sshll.u32 %s46_s1, 3  ;;  %p41_p2 = scmp.ge.s32.totalorder %s44_s6, 8  }
  0x2a   : > { %s49_s9 = scalar_lea.vmem [#allocation2], %s209_s8  ;;  %s307_s11 = smov (%p41_p2), [#allocation7]  }
  0x2b   : > { %v78_v3 = vsub.s32 0, %v77_v2  ;;  %v98_v4 = vsub.s32 1, %v77_v2  ;;  %v126_v5 = vsub.s32 2, %v77_v2  ;;  %v154_v6 = vsub.s32 3, %v77_v2  ;;  %v50_v7 = vld [vmem:[%s49_s9] sm:$0xff]  ;;  %v51_v12 = vld [vmem:[%s49_s9 + $0x8] sm:$0xff] }
  0x2c   : > { %v52_v13 = vunpack.c.0.s8 %v50_v7  ;;  %v53_v14 = vunpack.c.1.s8 %v50_v7  ;;  %v54_v15 = vunpack.c.2.s8 %v50_v7  ;;  %v55_v16 = vunpack.c.3.s8 %v50_v7  ;;  %s186_s12 = sshll.u32 (%p41_p2), %s307_s11, 4  ;;  %s187_s12 = int_to_ptr.vmem [resolvable:$true] %s186_s12 }
  0x2d   : > { %v361_v8 = vrot.slane %v350_v0, %v78_v3  ;;  %v364_v9 = vrot.slane %v350_v0, %v98_v4  ;;  %v367_v10 = vrot.slane %v350_v0, %v126_v5  ;;  %v370_v11 = vrot.slane %v350_v0, %v154_v6  ;;  %s267_s13 = scalar_lea.vmem (%p41_p2), %s187_s12, 8192  ;;  %p272_p4 = scmp.lt.s32.totalorder (%p41_p2), %s187_s12, %s187_s12 }
  0x2e   : > { %v56_v17 = vunpack.c.0.s8 %v51_v12  ;;  %v57_v18 = vunpack.c.1.s8 %v51_v12  ;;  %v58_v19 = vunpack.c.2.s8 %v51_v12  ;;  %v59_v20 = vunpack.c.3.s8 %v51_v12  ;;  %p268_p3 = scmp.ne.s32.totalorder (%p41_p2), %s187_s12, %s267_s13  ;;  %p273_p5 = scmp.lt.s32.totalorder (%p41_p2), %s267_s13, %s267_s13 }
  0x2f   : > { %v60_v21 = vand.u32 255, %v52_v13  ;;  %v61_v22 = vand.u32 255, %v53_v14  ;;  %v62_v23 = vand.u32 255, %v54_v15  ;;  %v63_v24 = vand.u32 255, %v55_v16 }
  0x30   : > { %v64_v25 = vand.u32 255, %v56_v17  ;;  %v372_v26 = vand.u32 255, %v57_v18  ;;  %v374_v27 = vand.u32 255, %v58_v19  ;;  %v376_v28 = vand.u32 255, %v59_v20  ;;  %p274_p6 = por (%p41_p2), %p273_p5, %p272_p4 }
  0x31   : > { %vm68_vm0 = vcmp.eq.s32.totalorder %v60_v21, 0  ;;  %vm88_vm1 = vcmp.eq.s32.totalorder %v60_v21, 1  ;;  %vm116_vm2 = vcmp.eq.s32.totalorder %v60_v21, 2  ;;  %vm144_vm3 = vcmp.eq.s32.totalorder %v60_v21, 3 }
  0x32   : > { %v80_v29 = vsel %vm68_vm0, %v361_v8, 0.0  ;;  %v100_v30 = vsel %vm88_vm1, %v364_v9, 0.0  ;;  %v128_v31 = vsel %vm116_vm2, %v367_v10, 0.0  ;;  %v156_v32 = vsel %vm144_vm3, %v370_v11, 0.0  ;;  %p275_p7 = pnand (%p41_p2), %p274_p6, %p268_p3 }
  0x33   : > { %v108_v33 = vadd.f32 %v100_v30, %v80_v29  ;;  %vm69_vm4 = vcmp.eq.s32.totalorder %v61_v22, 0  ;;  %vm89_vm5 = vcmp.eq.s32.totalorder %v61_v22, 1  ;;  %vm117_vm6 = vcmp.eq.s32.totalorder %v61_v22, 2 }
  0x34   : > { %v81_v34 = vsel %vm69_vm4, %v361_v8, 0.0  ;;  %v101_v35 = vsel %vm89_vm5, %v364_v9, 0.0  ;;  %v129_v36 = vsel %vm117_vm6, %v367_v10, 0.0  ;;  %vm145_vm7 = vcmp.eq.s32.totalorder %v61_v22, 3 }
  0x35   : > { %v136_v37 = vadd.f32 %v128_v31, %v108_v33  ;;  %v109_v38 = vadd.f32 %v101_v35, %v81_v34  ;;  %v157_v39 = vsel %vm145_vm7, %v370_v11, 0.0  ;;  %vm70_vm8 = vcmp.eq.s32.totalorder %v62_v23, 0 }
  0x36   : > { %v82_v40 = vsel %vm70_vm8, %v361_v8, 0.0  ;;  %vm90_vm9 = vcmp.eq.s32.totalorder %v62_v23, 1  ;;  %vm118_vm10 = vcmp.eq.s32.totalorder %v62_v23, 2  ;;  %vm146_vm11 = vcmp.eq.s32.totalorder %v62_v23, 3 }
  0x37   : > { %v164_v41 = vadd.f32 %v156_v32, %v136_v37  ;;  %v137_v42 = vadd.f32 %v129_v36, %v109_v38  ;;  %v102_v43 = vsel %vm90_vm9, %v364_v9, 0.0  ;;  %v130_v44 = vsel %vm118_vm10, %v367_v10, 0.0 }
  0x38   : > { %v110_v45 = vadd.f32 %v102_v43, %v82_v40  ;;  %v158_v46 = vsel %vm146_vm11, %v370_v11, 0.0  ;;  %vm71_vm12 = vcmp.eq.s32.totalorder %v63_v24, 0  ;;  %vm91_vm13 = vcmp.eq.s32.totalorder %v63_v24, 1 }
  0x39   : > { %173 = vst [vmem:[%s392_s10] sm:$0xff] %v164_v41  ;;  %v165_v47 = vadd.f32 %v157_v39, %v137_v42  ;;  %v83_v48 = vsel %vm71_vm12, %v361_v8, 0.0  ;;  %v103_v49 = vsel %vm91_vm13, %v364_v9, 0.0  ;;  %vm119_vm14 = vcmp.eq.s32.totalorder %v63_v24, 2 }
  0x3a   : > { %v138_v50 = vadd.f32 %v130_v44, %v110_v45  ;;  %v111_v51 = vadd.f32 %v103_v49, %v83_v48  ;;  %v131_v52 = vsel %vm119_vm14, %v367_v10, 0.0  ;;  %vm147_vm15 = vcmp.eq.s32.totalorder %v63_v24, 3 }
  0x3b   : > { %174 = vst [vmem:[%s392_s10 + $0x8] sm:$0xff] %v165_v47  ;;  %v159_v53 = vsel %vm147_vm15, %v370_v11, 0.0  ;;  %vm72_vm0 = vcmp.eq.s32.totalorder %v64_v25, 0  ;;  %vm92_vm1 = vcmp.eq.s32.totalorder %v64_v25, 1  ;;  %vm120_vm2 = vcmp.eq.s32.totalorder %v64_v25, 2 }
  0x3c   : > { %v166_v54 = vadd.f32 %v158_v46, %v138_v50  ;;  %v139_v55 = vadd.f32 %v131_v52, %v111_v51  ;;  %v84_v56 = vsel %vm72_vm0, %v361_v8, 0.0  ;;  %v104_v57 = vsel %vm92_vm1, %v364_v9, 0.0 }
  0x3d   : > { %v112_v58 = vadd.f32 %v104_v57, %v84_v56  ;;  %v132_v59 = vsel %vm120_vm2, %v367_v10, 0.0  ;;  %vm148_vm3 = vcmp.eq.s32.totalorder %v64_v25, 3  ;;  %vm73_vm4 = vcmp.eq.s32.totalorder %v372_v26, 0 }
  0x3e   : > { %175 = vst [vmem:[%s392_s10 + $0x10] sm:$0xff] %v166_v54  ;;  %v167_v60 = vadd.f32 %v159_v53, %v139_v55  ;;  %v160_v61 = vsel %vm148_vm3, %v370_v11, 0.0  ;;  %v85_v62 = vsel %vm73_vm4, %v361_v8, 0.0  ;;  %vm93_vm5 = vcmp.eq.s32.totalorder %v372_v26, 1 }
  0x3f   : > { %v140_v63 = vadd.f32 %v132_v59, %v112_v58  ;;  %v105_v1 = vsel %vm93_vm5, %v364_v9, 0.0  ;;  %vm121_vm6 = vcmp.eq.s32.totalorder %v372_v26, 2  ;;  %vm149_vm7 = vcmp.eq.s32.totalorder %v372_v26, 3 }
  0x40   : > { %176 = vst [vmem:[%s392_s10 + $0x18] sm:$0xff] %v167_v60  ;;  %v113_v2 = vadd.f32 %v105_v1, %v85_v62  ;;  %v133_v3 = vsel %vm121_vm6, %v367_v10, 0.0  ;;  %v161_v4 = vsel %vm149_vm7, %v370_v11, 0.0  ;;  %vm74_vm8 = vcmp.eq.s32.totalorder %v374_v27, 0 }
  0x41   : > { %v168_v5 = vadd.f32 %v160_v61, %v140_v63  ;;  %v86_v6 = vsel %vm74_vm8, %v361_v8, 0.0  ;;  %vm94_vm9 = vcmp.eq.s32.totalorder %v374_v27, 1  ;;  %vm122_vm10 = vcmp.eq.s32.totalorder %v374_v27, 2 }
  0x42   : > { %v141_v7 = vadd.f32 %v133_v3, %v113_v2  ;;  %v106_v12 = vsel %vm94_vm9, %v364_v9, 0.0  ;;  %v134_v13 = vsel %vm122_vm10, %v367_v10, 0.0  ;;  %vm150_vm11 = vcmp.eq.s32.totalorder %v374_v27, 3 }
  0x43   : > { %177 = vst [vmem:[%s392_s10 + $0x20] sm:$0xff] %v168_v5  ;;  %v114_v14 = vadd.f32 %v106_v12, %v86_v6  ;;  %v162_v15 = vsel %vm150_vm11, %v370_v11, 0.0  ;;  %vm75_vm12 = vcmp.eq.s32.totalorder %v376_v28, 0  ;;  %vm95_vm13 = vcmp.eq.s32.totalorder %v376_v28, 1 }
  0x44   : > { %v169_v16 = vadd.f32 %v161_v4, %v141_v7  ;;  %v87_v17 = vsel %vm75_vm12, %v361_v8, 0.0  ;;  %v107_v18 = vsel %vm95_vm13, %v364_v9, 0.0  ;;  %vm123_vm14 = vcmp.eq.s32.totalorder %v376_v28, 2 }
  0x45   : > { %v142_v19 = vadd.f32 %v134_v13, %v114_v14  ;;  %v115_v20 = vadd.f32 %v107_v18, %v87_v17  ;;  %v135_v21 = vsel %vm123_vm14, %v367_v10, 0.0  ;;  %vm151_vm15 = vcmp.eq.s32.totalorder %v376_v28, 3  ;;  %43 = sbr.rel (!%p41_p2) target bundleno = 39 (0x27), region = 45 }
  0x46   : > { %178 = vst [vmem:[%s392_s10 + $0x28] sm:$0xff] %v169_v16  ;;  %v163_v22 = vsel %vm151_vm15, %v370_v11, 0.0 }
  0x47   : > { %v170_v23 = vadd.f32 %v162_v15, %v142_v19  ;;  %v143_v24 = vadd.f32 %v135_v21, %v115_v20 }
  0x49   : > { %179 = vst [vmem:[%s392_s10 + $0x30] sm:$0xff] %v170_v23  ;;  %v171_v25 = vadd.f32 %v163_v22, %v143_v24 }
  0x4b   : > { %180 = vst [vmem:[%s392_s10 + $0x38] sm:$0xff] %v171_v25 }
  0x4c   :  { %278 = shalt.err (!%p275_p7)
}
  0x4d   :  { %s279_s16 = scalar_lea.hbm %s454_s2, 8192 }
  0x4e   :  { %p280_p8 = scmp.ne.s32.totalorder %s454_s2, %s279_s16  ;;  %p283_p9 = scmp.lt.u32.totalorder %s279_s16, %s454_s2 }
  0x50   :  { %p285_p10 = pnand %p283_p9, %p280_p8 }
  0x52   :  { %288 = shalt.err (!%p285_p10)
}
  0x53   :  { %192 = dma.vmem_to_hbm [thread:$0]  %s187_s12, 8192, %s454_s2, [#allocation4], %s304_s19, %s304_s19, %s305_s20  }
  0x54   :  { %297 = dma.done.wait [#allocation4], 8192  }
  0x55   :  { %298 = vsyncadd [#allocation4], 4294959104 }
  0x56   :  { %196 = vsyncpa [#allocation3], 1 }
  0x57   :  { %197 = vsyncpa [#allocation6], 1 }
  0x58   :  { %198 = vsyncpa [#allocation4], 1 }

</bundles_post_ra>
